<compile_context>
chip_gen: v6e
topology: v6e:2x2x1
jax: 0.10.0
libtpu: 0.0.40
codegen_flags: <defaults>
</compile_context>

<pallas_src>
import jax
import jax.numpy as jnp
from jax.experimental import pallas as pl
from jax.experimental.pallas import tpu as pltpu


def _round_up(v, m):
    return ((v + m - 1) // m) * m


def _cdiv(a, b):
    return (a + b - 1) // b


def _choose_tile(full, target, align):
    """Pick (tile, padded_full).

    If `full` fits inside `target`, use the full dim as a single block (no
    alignment / padding needed).  Otherwise choose a near-target tile that is a
    multiple of `align`, and pad `full` up to a whole number of tiles so every
    grid block is full (no partial-block masked stores, minimal padding).
    """
    target = _round_up(max(target, align), align)
    if full <= target:
        return full, full
    full_a = _round_up(full, align)
    num_blocks = _cdiv(full_a, target)
    tile = _round_up(_cdiv(full_a, num_blocks), align)
    return tile, tile * num_blocks


# ----------------------------- kernels --------------------------------------

def _bitparm_kernel(x_ref, sp_h_ref, b_ref, tanh_a_ref, o_ref):
    # x_ref : (TR, TS)   sp_h_ref / b_ref / tanh_a_ref : (TR, 1)
    y = x_ref[...] * sp_h_ref[...] + b_ref[...]
    o_ref[...] = (y + jnp.tanh(y) * tanh_a_ref[...]).astype(o_ref.dtype)


def _bitparm_final_kernel(x_ref, sp_h_ref, b_ref, o_ref):
    y = x_ref[...] * sp_h_ref[...] + b_ref[...]
    o_ref[...] = jax.nn.sigmoid(y).astype(o_ref.dtype)


# ----------------------------- wrapper ---------------------------------------

def bitparm_forward(x, h, b, a=None, final=False, *, row_tile=256, lane_tile=2048):
    """x: (N, C, H, W) float32; h, b, a: (1, C, 1, 1) float32."""
    N, C, H, W = x.shape
    R, S = N * C, H * W

    TR, Rp = _choose_tile(R, row_tile, 8)
    TS, Sp = _choose_tile(S, lane_tile, 128)

    x2 = x.reshape(R, S)
    if (Rp, Sp) != (R, S):
        x2 = jnp.pad(x2, ((0, Rp - R), (0, Sp - S)))

    def expand(p):
        # (1, C, 1, 1) -> per-row column (Rp, 1); row index = n*C + c.
        pc = p.reshape(1, C).astype(jnp.float32)
        col = jnp.broadcast_to(pc, (N, C)).reshape(R, 1)
        if Rp != R:
            col = jnp.pad(col, ((0, Rp - R), (0, 0)))
        return col

    # Hoist the per-channel transcendentals out of the hot loop.
    sp_h_col = expand(jax.nn.softplus(h))
    b_col = expand(b)

    grid = (Rp // TR, Sp // TS)
    x_spec = pl.BlockSpec((TR, TS), lambda i, j: (i, j))
    par_spec = pl.BlockSpec((TR, 1), lambda i, j: (i, 0))
    out_spec = pl.BlockSpec((TR, TS), lambda i, j: (i, j))
    out_shape = jax.ShapeDtypeStruct((Rp, Sp), x.dtype)
    cparams = pltpu.CompilerParams(
        dimension_semantics=("parallel", "parallel"))

    if final:
        out2 = pl.pallas_call(
            _bitparm_final_kernel,
            out_shape=out_shape,
            grid=grid,
            in_specs=[x_spec, par_spec, par_spec],
            out_specs=out_spec,
            compiler_params=cparams,
        )(x2, sp_h_col, b_col)
    else:
        assert a is not None
        tanh_a_col = expand(jnp.tanh(a))
        out2 = pl.pallas_call(
            _bitparm_kernel,
            out_shape=out_shape,
            grid=grid,
            in_specs=[x_spec, par_spec, par_spec, par_spec],
            out_specs=out_spec,
            compiler_params=cparams,
        )(x2, sp_h_col, b_col, tanh_a_col)

    if (Rp, Sp) != (R, S):
        out2 = out2[:R, :S]
    return out2.reshape(N, C, H, W)


def bitparm_reference(x, h, b, a=None, final=False):
    """Pure-JAX reference mirroring the PyTorch forward (NCHW broadcast)."""
    sp_h = jax.nn.softplus(h)
    y = x * sp_h + b
    if final:
        return jax.nn.sigmoid(y)
    return y + jnp.tanh(y) * jnp.tanh(a)


if __name__ == "__main__":
    key = jax.random.PRNGKey(0)
    kx, kh, kb, ka, kx2 = jax.random.split(key, 5)

    N, C, H, W = 2, 4, 16, 16
    x = jax.random.normal(kx, (N, C, H, W), dtype=jnp.float32)

    # Deterministic init matching torch.nn.init.normal_(mean=0, std=0.01), shape (1, C, 1, 1)
    h = 0.01 * jax.random.normal(kh, (1, C, 1, 1), dtype=jnp.float32)
    b = 0.01 * jax.random.normal(kb, (1, C, 1, 1), dtype=jnp.float32)
    a = 0.01 * jax.random.normal(ka, (1, C, 1, 1), dtype=jnp.float32)

    # non-final branch (default Bitparm(channel)) -- aligned shape, single block.
    out = bitparm_forward(x, h, b, a, final=False)
    out = jax.block_until_ready(out)
    ref = bitparm_reference(x, h, b, a, final=False)
    assert out.shape == (N, C, H, W)
    assert jnp.allclose(out, ref, atol=1e-5, rtol=1e-5)

    # final branch (Bitparm(channel, final=True))
    out_f = bitparm_forward(x, h, b, final=True)
    out_f = jax.block_until_ready(out_f)
    ref_f = bitparm_reference(x, h, b, final=True)
    assert jnp.allclose(out_f, ref_f, atol=1e-5, rtol=1e-5)

    # Non-(8,128)-aligned shape at default tiles: exercises the no-padding,
    # full-dim single-block path.
    N2, C2, H2, W2 = 2, 6, 20, 20
    x2 = jax.random.normal(kx2, (N2, C2, H2, W2), dtype=jnp.float32)
    h2 = jnp.broadcast_to(h[:, :1], (1, C2, 1, 1))
    b2 = jnp.broadcast_to(b[:, :1], (1, C2, 1, 1))
    a2 = jnp.broadcast_to(a[:, :1], (1, C2, 1, 1))
    out_s = bitparm_forward(x2, h2, b2, a2, final=False)
    out_s = jax.block_until_ready(out_s)
    ref_s = bitparm_reference(x2, h2, b2, a2, final=False)
    assert out_s.shape == (N2, C2, H2, W2)
    assert jnp.allclose(out_s, ref_s, atol=1e-5, rtol=1e-5)

    # Same shape with tiny tiles: exercises the multi-tile grid + minimal
    # padding path (rows 12->16, lanes 400->512, grid (2, 4)).
    out_t = bitparm_forward(x2, h2, b2, a2, final=False, row_tile=8, lane_tile=128)
    out_t = jax.block_until_ready(out_t)
    assert out_t.shape == (N2, C2, H2, W2)
    assert jnp.allclose(out_t, ref_s, atol=1e-5, rtol=1e-5)

    print("KERNEL_OK")
</pallas_src>

<mosaic_0001>
module attributes {stable_mosaic.version = 11 : i64} {
  func.func @_bitparm_kernel(%arg0: i32, %arg1: i32, %arg2: memref<8x256xf32, #tpu.memory_space<vmem>>, %arg3: memref<8x1xf32, #tpu.memory_space<vmem>>, %arg4: memref<8x1xf32, #tpu.memory_space<vmem>>, %arg5: memref<8x1xf32, #tpu.memory_space<vmem>>, %arg6: memref<8x256xf32, #tpu.memory_space<vmem>>) attributes {dimension_semantics = [#tpu.dimension_semantics<parallel>, #tpu.dimension_semantics<parallel>], iteration_bounds = array<i64: 1, 1>, scalar_prefetch = 0 : i64, scratch_operands = 0 : i64, tpu.core_type = #tpu.core_type<tc>, window_params = [{transform_indices = @transform_0, window_bounds = array<i64: 8, 256>}, {transform_indices = @transform_1, window_bounds = array<i64: 8, 1>}, {transform_indices = @transform_2, window_bounds = array<i64: 8, 1>}, {transform_indices = @transform_3, window_bounds = array<i64: 8, 1>}, {transform_indices = @transform_4, window_bounds = array<i64: 8, 256>}]} {
    %c0 = arith.constant 0 : index
    %c0_0 = arith.constant 0 : index
    %0 = vector.load %arg2[%c0, %c0_0] : memref<8x256xf32, #tpu.memory_space<vmem>>, vector<8x256xf32>
    %c0_1 = arith.constant 0 : index
    %c0_2 = arith.constant 0 : index
    %1 = vector.load %arg3[%c0_1, %c0_2] : memref<8x1xf32, #tpu.memory_space<vmem>>, vector<8x1xf32>
    %2 = vector.broadcast %1 : vector<8x1xf32> to vector<8x256xf32>
    %3 = arith.mulf %0, %2 : vector<8x256xf32>
    %c0_3 = arith.constant 0 : index
    %c0_4 = arith.constant 0 : index
    %4 = vector.load %arg4[%c0_3, %c0_4] : memref<8x1xf32, #tpu.memory_space<vmem>>, vector<8x1xf32>
    %5 = vector.broadcast %4 : vector<8x1xf32> to vector<8x256xf32>
    %6 = arith.addf %3, %5 : vector<8x256xf32>
    %7 = math.tanh %6 : vector<8x256xf32>
    %c0_5 = arith.constant 0 : index
    %c0_6 = arith.constant 0 : index
    %8 = vector.load %arg5[%c0_5, %c0_6] : memref<8x1xf32, #tpu.memory_space<vmem>>, vector<8x1xf32>
    %9 = vector.broadcast %8 : vector<8x1xf32> to vector<8x256xf32>
    %10 = arith.mulf %7, %9 : vector<8x256xf32>
    %11 = arith.addf %6, %10 : vector<8x256xf32>
    %c0_7 = arith.constant 0 : index
    %c0_8 = arith.constant 0 : index
    %12 = vector.load %arg6[%c0_7, %c0_8] : memref<8x256xf32, #tpu.memory_space<vmem>>, vector<8x256xf32>
    tpu.vector_store %arg6[%c0_7, %c0_8], %11 {strides = array<i32>} : memref<8x256xf32, #tpu.memory_space<vmem>>, vector<8x256xf32>,
    return
  }
  func.func @transform_0(%arg0: i32, %arg1: i32) -> (i32, i32) {
    %c0_i32 = arith.constant 0 : i32
    return %arg0, %arg1 : i32, i32
  }
  func.func @transform_1(%arg0: i32, %arg1: i32) -> (i32, i32) {
    %c0_i32 = arith.constant 0 : i32
    %c0_i32_0 = arith.constant 0 : i32
    return %arg0, %c0_i32 : i32, i32
  }
  func.func @transform_2(%arg0: i32, %arg1: i32) -> (i32, i32) {
    %c0_i32 = arith.constant 0 : i32
    %c0_i32_0 = arith.constant 0 : i32
    return %arg0, %c0_i32 : i32, i32
  }
  func.func @transform_3(%arg0: i32, %arg1: i32) -> (i32, i32) {
    %c0_i32 = arith.constant 0 : i32
    %c0_i32_0 = arith.constant 0 : i32
    return %arg0, %c0_i32 : i32, i32
  }
  func.func @transform_4(%arg0: i32, %arg1: i32) -> (i32, i32) {
    %c0_i32 = arith.constant 0 : i32
    return %arg0, %arg1 : i32, i32
  }
}

</mosaic_0001>

<bundles_post_ra>
// kernel: tpu_custom_call.1
= control target key start
LH: loop header
LB: loop body
LE: loop exit
PB: predicated region body
PF: predicated region fallthrough
CT: control target
= control target key end

     0   :  { %v94_v2 = vmov 0   ;;  %s139_s0 = inlined_call_operand.vmem [shape: f32[8,256], index: 0, kind: input, shape index: {}]   ;;  %s140_s1 = inlined_call_operand.vmem [shape: f32[8,1], index: 1, kind: input, shape index: {}]   ;;  %s141_s2 = inlined_call_operand.vmem [shape: f32[8,1], index: 2, kind: input, shape index: {}]   ;;  %s142_s3 = inlined_call_operand.vmem [shape: f32[8,1], index: 3, kind: input, shape index: {}]   ;;  %s143_s4 = inlined_call_operand.hbm [shape: f32[8,256], index: 4, kind: output, shape index: {}]  }
   0x1   :  { %v20_v0 = vld [vmem:[%s140_s1] sm:$0xff]  ;;  %66 = vset.pattern.permute.xlu0 %v94_v2  ;;  %67 = vset.pattern.permute.xlu1 %v94_v2 }
   0x2   :  { %v38_v1 = vld [vmem:[%s142_s3] sm:$0xff] }
   0x3   :  { %9 = vsyncpa [#allocation3], 0  ;;  %23 = vperm.xlu0 %66, %v20_v0   ;;  %41 = vperm.xlu1 %67, %v38_v1   ;;  %v28_v3 = vld [vmem:[%s141_s2] sm:$0xff]  ;;  %v19_v6 = vld [vmem:[%s139_s0 + $0x8] sm:$0xff]  ;;  %s95_s2 = smov [#allocation2]  }
   0x4   :  { %v18_v5 = vld [vmem:[%s139_s0] sm:$0xff]  ;;  %s56_s3 = sshll.u32 %s95_s2, 4  ;;  %s57_s3 = int_to_ptr.vmem [resolvable:$true] %s56_s3 }
   0x5   :  { %s72_s0 = scalar_lea.vmem %s57_s3, 256  ;;  %p77_p1 = scmp.lt.s32.totalorder %s57_s3, %s57_s3 }
   0x6   :  { %p73_p0 = scmp.ne.s32.totalorder %s57_s3, %s72_s0  ;;  %p78_p2 = scmp.lt.s32.totalorder %s72_s0, %s72_s0 }
   0x7   :  { %31 = vperm.xlu0 %66, %v28_v3  }
   0x8   :  { %p79_p3 = por %p78_p2, %p77_p1 }
   0xa   :  { %p80_p4 = pnand %p79_p3, %p73_p0 }
  0x7e   :  { %v24_v4 = vpop.permute.xlu0 %23  ;;  %v42_v12 = vpop.permute.xlu1 %41 }
  0x7f   :  { %v26_v7 = vmul.f32 %v24_v4, %v18_v5  ;;  %v27_v8 = vmul.f32 %v24_v4, %v19_v6 }
  0x82   :  { %v32_v9 = vpop.permute.xlu0 %31 }
  0x83   :  { %v34_v10 = vadd.f32 %v32_v9, %v26_v7  ;;  %v35_v11 = vadd.f32 %v32_v9, %v27_v8 }
  0x85   :  { %68 = vtanh.f32 %v34_v10 }
  0x86   :  { %70 = vtanh.f32 %v35_v11 }
  0x92   :  { %v69_v13 = vpop.eup %68 }
  0x93   :  { %v71_v14 = vpop.eup %70  ;;  %v44_v15 = vmul.f32 %v69_v13, %v42_v12 }
  0x94   :  { %v45_v16 = vmul.f32 %v71_v14, %v42_v12 }
  0x95   :  { %v46_v17 = vadd.f32 %v44_v15, %v34_v10 }
  0x96   :  { %v47_v18 = vadd.f32 %v45_v16, %v35_v11 }
  0x97   :  { %48 = vst [vmem:[#allocation2] sm:$0xff] %v46_v17 }
  0x98   :  { %49 = vst [vmem:[#allocation2 + $0x8] sm:$0xff] %v47_v18 }
  0x99   :  { %83 = shalt.err (!%p80_p4)
}
  0x9a   :  { %59 = dma.vmem_to_hbm [thread:$0]  %s57_s3, 256, %s143_s4, [#allocation3]  }
  0x9b   :  { %92 = dma.done.wait [#allocation3], 256  }
  0x9c   :  { %93 = vsyncadd [#allocation3], 4294967040 }
  0x9d   :  { %63 = vsyncpa [#allocation3], 1 }

</bundles_post_ra>
